<compile_context>
chip_gen: v6e
topology: v6e:2x2x1
jax: 0.10.0
libtpu: 0.0.40
codegen_flags: <defaults>
</compile_context>

<pallas_src>
import jax
import jax.numpy as jnp
from jax.experimental import pallas as pl
from jax.experimental.pallas import tpu as pltpu


# ----------------------------------------------------------------------------
# Pallas kernel: double Conv1d (+ folded BN) + Sigmoid for one batch element.
# ----------------------------------------------------------------------------
def _up_sc_conv_kernel(y_ref, s_ref, w1_ref, a1_ref, c1_ref,
                       w2_ref, a2_ref, c2_ref, o_ref):
    # y_ref : (Cin, T)     upsampled, skip-concatenated input (one batch elem)
    # s_ref : (K, T, T)    one-hot shift matrices: (v @ S[k])[:, t] = v[:, t+k-pad]
    # w1_ref: (K, C1, Cin) conv1 weight, tap-major
    # a1/c1 : (C1, 1)      folded conv-bias + eval-mode BatchNorm scale / shift
    # w2_ref: (K, C2, C1)  conv2 weight, tap-major
    # a2/c2 : (C2, 1)
    # o_ref : (C2, T)
    n_taps = w1_ref.shape[0]
    n_c1 = w1_ref.shape[1]
    n_c2 = w2_ref.shape[1]
    t = o_ref.shape[-1]

    y = y_ref[...].astype(jnp.float32)

    # ---- conv1 ("same" padding via the shift matrices) ----
    acc1 = jnp.zeros((n_c1, t), jnp.float32)
    for k in range(n_taps):
        y_k = jnp.dot(y, s_ref[k], preferred_element_type=jnp.float32)
        acc1 = acc1 + jnp.dot(w1_ref[k], y_k,
                              preferred_element_type=jnp.float32)
    h1 = jax.nn.sigmoid(acc1 * a1_ref[...] + c1_ref[...])

    # ---- conv2 ----
    acc2 = jnp.zeros((n_c2, t), jnp.float32)
    for k in range(n_taps):
        h_k = jnp.dot(h1, s_ref[k], preferred_element_type=jnp.float32)
        acc2 = acc2 + jnp.dot(w2_ref[k], h_k,
                              preferred_element_type=jnp.float32)
    out = jax.nn.sigmoid(acc2 * a2_ref[...] + c2_ref[...])
    o_ref[...] = out.astype(o_ref.dtype)


# ----------------------------------------------------------------------------
# Wrapper
# ----------------------------------------------------------------------------
def _upsample_linear_x2(x):
    """nn.Upsample(scale_factor=2, mode='linear', align_corners=False)."""
    left = jnp.concatenate([x[..., :1], x[..., :-1]], axis=-1)
    right = jnp.concatenate([x[..., 1:], x[..., -1:]], axis=-1)
    even = 0.75 * x + 0.25 * left          # output positions 2i
    odd = 0.75 * x + 0.25 * right          # output positions 2i + 1
    b, c, l = x.shape
    return jnp.stack([even, odd], axis=-1).reshape(b, c, 2 * l)


def up_with_sc_forward(x, skip, params, *, eps=1e-5):
    """Forward of Up_with_sc (defaults: bilinear, concat, n_convs=2, Sigmoid,
    normalize_last=True). BatchNorm is applied in eval mode."""
    (w1, b1, g1, be1, m1, v1, w2, b2, g2, be2, m2, v2) = params

    # --- concat skip connection + linear x2 upsample (cheap JAX glue) ---
    x1 = jnp.concatenate([skip, x], axis=1)            # (B, Cin, L)
    y = _upsample_linear_x2(x1)                        # (B, Cin, T = 2L)
    # TODO(synk): fuse the concat + upsample into the kernel (polyphase
    # decomposition) to save one HBM round trip of the upsampled tensor.

    B, Cin, T = y.shape
    C1, _, K = w1.shape
    C2 = w2.shape[0]
    pad = (K - 1) // 2

    # Tap-major weights: tiny one-time relayout (few KB), not a big transpose.
    w1t = jnp.transpose(w1, (2, 0, 1)).astype(jnp.float32)   # (K, C1, Cin)
    w2t = jnp.transpose(w2, (2, 0, 1)).astype(jnp.float32)   # (K, C2, C1)

    # Fold conv bias + eval-mode BatchNorm into per-channel scale / shift.
    s1 = g1 / jnp.sqrt(v1 + eps)
    a1 = s1.reshape(C1, 1).astype(jnp.float32)
    c1 = ((b1 - m1) * s1 + be1).reshape(C1, 1).astype(jnp.float32)
    s2 = g2 / jnp.sqrt(v2 + eps)
    a2 = s2.reshape(C2, 1).astype(jnp.float32)
    c2 = ((b2 - m2) * s2 + be2).reshape(C2, 1).astype(jnp.float32)

    # One-hot shift matrices: (v @ S[k])[:, t] == v[:, t + k - pad], with
    # zeros outside [0, T) — exactly the "same"-padding conv taps.
    shift = jnp.stack(
        [jnp.eye(T, dtype=jnp.float32, k=-(k - pad)) for k in range(K)])

    flops = int(2 * B * K * (T * T * (Cin + C1) + T * (C1 * Cin + C2 * C1)))
    transcendentals = int(B * T * (C1 + C2))
    bytes_accessed = int(4 * (y.size + shift.size + w1t.size + w2t.size
                              + 2 * (C1 + C2) + B * C2 * T))

    out = pl.pallas_call(
        _up_sc_conv_kernel,
        out_shape=jax.ShapeDtypeStruct((B, C2, T), x.dtype),
        grid=(B,),
        in_specs=[
            pl.BlockSpec((None, Cin, T), lambda b: (b, 0, 0)),   # per-batch input
            pl.BlockSpec((K, T, T), lambda b: (0, 0, 0)),        # shift matrices
            pl.BlockSpec((K, C1, Cin), lambda b: (0, 0, 0)),
            pl.BlockSpec((C1, 1), lambda b: (0, 0)),
            pl.BlockSpec((C1, 1), lambda b: (0, 0)),
            pl.BlockSpec((K, C2, C1), lambda b: (0, 0, 0)),
            pl.BlockSpec((C2, 1), lambda b: (0, 0)),
            pl.BlockSpec((C2, 1), lambda b: (0, 0)),
        ],
        out_specs=pl.BlockSpec((None, C2, T), lambda b: (b, 0, 0)),
        compiler_params=pltpu.CompilerParams(
            dimension_semantics=("parallel",)),
        cost_estimate=pl.CostEstimate(
            flops=flops, transcendentals=transcendentals,
            bytes_accessed=bytes_accessed),
    )(y, shift, w1t, a1, c1, w2t, a2, c2)
    return out


# ----------------------------------------------------------------------------
# Pure-JAX reference (independent path: lax.conv_general_dilated + explicit BN)
# ----------------------------------------------------------------------------
def _ref_conv1d(x, w, b, pad):
    y = jax.lax.conv_general_dilated(
        x, w, window_strides=(1,), padding=[(pad, pad)],
        dimension_numbers=("NCH", "OIH", "NCH"),
        precision=jax.lax.Precision.HIGHEST)
    return y + b[None, :, None]


def _ref_bn(x, g, be, m, v, eps=1e-5):
    return ((x - m[None, :, None]) / jnp.sqrt(v + eps)[None, :, None]
            * g[None, :, None] + be[None, :, None])


def _ref_forward(x, skip, params, eps=1e-5):
    (w1, b1, g1, be1, m1, v1, w2, b2, g2, be2, m2, v2) = params
    pad = (w1.shape[-1] - 1) // 2
    x1 = jnp.concatenate([skip, x], axis=1)
    y = _upsample_linear_x2(x1)
    h = jax.nn.sigmoid(_ref_bn(_ref_conv1d(y, w1, b1, pad), g1, be1, m1, v1, eps))
    h = jax.nn.sigmoid(_ref_bn(_ref_conv1d(h, w2, b2, pad), g2, be2, m2, v2, eps))
    return h


if __name__ == "__main__":
    # Small shapes consistent with the module: 1-D feature maps (B, C, L).
    B = 2
    skip_ch, x_ch = 4, 4
    Cin = skip_ch + x_ch               # in_channels after the skip concat
    C1, C2 = 16, 32                    # out_channels = [16, 32], n_convs = 2
    L = 64                             # input length -> upsampled T = 128 (lane dense)
    K = 3                              # kernel_size (odd -> 'same' padding)

    key = jax.random.PRNGKey(0)
    ks = jax.random.split(key, 14)

    x = jax.random.normal(ks[0], (B, x_ch, L), dtype=jnp.float32)
    skip = jax.random.normal(ks[1], (B, skip_ch, L), dtype=jnp.float32)

    # PyTorch-layout parameters: conv weight (Cout, Cin, K), bias (Cout,),
    # BatchNorm gamma/beta/running_mean/running_var (Cout,).
    w1 = 0.2 * jax.random.normal(ks[2], (C1, Cin, K), dtype=jnp.float32)
    b1 = 0.1 * jax.random.normal(ks[3], (C1,), dtype=jnp.float32)
    g1 = 1.0 + 0.1 * jax.random.normal(ks[4], (C1,), dtype=jnp.float32)
    be1 = 0.1 * jax.random.normal(ks[5], (C1,), dtype=jnp.float32)
    m1 = 0.1 * jax.random.normal(ks[6], (C1,), dtype=jnp.float32)
    v1 = 0.5 + jax.nn.softplus(jax.random.normal(ks[7], (C1,), dtype=jnp.float32))

    w2 = 0.15 * jax.random.normal(ks[8], (C2, C1, K), dtype=jnp.float32)
    b2 = 0.1 * jax.random.normal(ks[9], (C2,), dtype=jnp.float32)
    g2 = 1.0 + 0.1 * jax.random.normal(ks[10], (C2,), dtype=jnp.float32)
    be2 = 0.1 * jax.random.normal(ks[11], (C2,), dtype=jnp.float32)
    m2 = 0.1 * jax.random.normal(ks[12], (C2,), dtype=jnp.float32)
    v2 = 0.5 + jax.nn.softplus(jax.random.normal(ks[13], (C2,), dtype=jnp.float32))

    params = (w1, b1, g1, be1, m1, v1, w2, b2, g2, be2, m2, v2)

    out = up_with_sc_forward(x, skip, params)
    jax.block_until_ready(out)

    ref = _ref_forward(x, skip, params)
    assert out.shape == (B, C2, 2 * L), out.shape
    assert jnp.allclose(out, ref, atol=5e-3, rtol=5e-3), \
        float(jnp.max(jnp.abs(out - ref)))

    print("KERNEL_OK")
</pallas_src>

<mosaic_0001>
module attributes {stable_mosaic.version = 11 : i64} {
  func.func @_up_sc_conv_kernel(%arg0: i32, %arg1: memref<1x8x128xf32, #tpu.memory_space<vmem>>, %arg2: memref<3x128x128xf32, #tpu.memory_space<vmem>>, %arg3: memref<3x16x8xf32, #tpu.memory_space<vmem>>, %arg4: memref<16x1xf32, #tpu.memory_space<vmem>>, %arg5: memref<16x1xf32, #tpu.memory_space<vmem>>, %arg6: memref<3x32x16xf32, #tpu.memory_space<vmem>>, %arg7: memref<32x1xf32, #tpu.memory_space<vmem>>, %arg8: memref<32x1xf32, #tpu.memory_space<vmem>>, %arg9: memref<1x32x128xf32, #tpu.memory_space<vmem>>) attributes {dimension_semantics = [#tpu.dimension_semantics<parallel>], iteration_bounds = array<i64: 2>, scalar_prefetch = 0 : i64, scratch_operands = 0 : i64, tpu.core_type = #tpu.core_type<tc>, window_params = [{transform_indices = @transform_0, window_bounds = array<i64: 1, 8, 128>}, {pipeline_mode = #tpu.pipeline_mode<synchronous>, transform_indices = @transform_1, window_bounds = array<i64: 3, 128, 128>}, {pipeline_mode = #tpu.pipeline_mode<synchronous>, transform_indices = @transform_2, window_bounds = array<i64: 3, 16, 8>}, {pipeline_mode = #tpu.pipeline_mode<synchronous>, transform_indices = @transform_3, window_bounds = array<i64: 16, 1>}, {pipeline_mode = #tpu.pipeline_mode<synchronous>, transform_indices = @transform_4, window_bounds = array<i64: 16, 1>}, {pipeline_mode = #tpu.pipeline_mode<synchronous>, transform_indices = @transform_5, window_bounds = array<i64: 3, 32, 16>}, {pipeline_mode = #tpu.pipeline_mode<synchronous>, transform_indices = @transform_6, window_bounds = array<i64: 32, 1>}, {pipeline_mode = #tpu.pipeline_mode<synchronous>, transform_indices = @transform_7, window_bounds = array<i64: 32, 1>}, {transform_indices = @transform_8, window_bounds = array<i64: 1, 32, 128>}]} {
    %c0 = arith.constant 0 : index
    %c0_0 = arith.constant 0 : index
    %c0_1 = arith.constant 0 : index
    %0 = vector.load %arg1[%c0, %c0_0, %c0_1] : memref<1x8x128xf32, #tpu.memory_space<vmem>>, vector<1x8x128xf32>
    %1 = vector.shape_cast %0 : vector<1x8x128xf32> to vector<8x128xf32>
    %cst = arith.constant 0.000000e+00 : f32
    %2 = vector.broadcast %cst : f32 to vector<16x128xf32>
    %c0_2 = arith.constant 0 : index
    %c0_3 = arith.constant 0 : index
    %c0_4 = arith.constant 0 : index
    %3 = vector.load %arg2[%c0_2, %c0_3, %c0_4] : memref<3x128x128xf32, #tpu.memory_space<vmem>>, vector<1x128x128xf32>
    %4 = vector.shape_cast %3 : vector<1x128x128xf32> to vector<128x128xf32>
    %cst_5 = arith.constant dense<0.000000e+00> : vector<8x128xf32>
    %5 = tpu.matmul %1, %4, %cst_5 {dimension_numbers = #tpu.dot_dimension_numbers<[1], [0], [0], [1], [0, 0, 1, 1], [], []>} : vector<8x128xf32>, vector<128x128xf32>, vector<8x128xf32> -> vector<8x128xf32>
    %c0_6 = arith.constant 0 : index
    %c0_7 = arith.constant 0 : index
    %c0_8 = arith.constant 0 : index
    %6 = vector.load %arg3[%c0_6, %c0_7, %c0_8] : memref<3x16x8xf32, #tpu.memory_space<vmem>>, vector<1x16x8xf32>
    %7 = vector.shape_cast %6 : vector<1x16x8xf32> to vector<16x8xf32>
    %cst_9 = arith.constant dense<0.000000e+00> : vector<16x128xf32>
    %8 = tpu.matmul %7, %5, %cst_9 {dimension_numbers = #tpu.dot_dimension_numbers<[1], [0], [0], [1], [0, 0, 1, 1], [], []>} : vector<16x8xf32>, vector<8x128xf32>, vector<16x128xf32> -> vector<16x128xf32>
    %9 = arith.addf %2, %8 : vector<16x128xf32>
    %c1 = arith.constant 1 : index
    %c0_10 = arith.constant 0 : index
    %c0_11 = arith.constant 0 : index
    %10 = vector.load %arg2[%c1, %c0_10, %c0_11] : memref<3x128x128xf32, #tpu.memory_space<vmem>>, vector<1x128x128xf32>
    %11 = vector.shape_cast %10 : vector<1x128x128xf32> to vector<128x128xf32>
    %cst_12 = arith.constant dense<0.000000e+00> : vector<8x128xf32>
    %12 = tpu.matmul %1, %11, %cst_12 {dimension_numbers = #tpu.dot_dimension_numbers<[1], [0], [0], [1], [0, 0, 1, 1], [], []>} : vector<8x128xf32>, vector<128x128xf32>, vector<8x128xf32> -> vector<8x128xf32>
    %c1_13 = arith.constant 1 : index
    %c0_14 = arith.constant 0 : index
    %c0_15 = arith.constant 0 : index
    %13 = vector.load %arg3[%c1_13, %c0_14, %c0_15] : memref<3x16x8xf32, #tpu.memory_space<vmem>>, vector<1x16x8xf32>
    %14 = vector.shape_cast %13 : vector<1x16x8xf32> to vector<16x8xf32>
    %cst_16 = arith.constant dense<0.000000e+00> : vector<16x128xf32>
    %15 = tpu.matmul %14, %12, %cst_16 {dimension_numbers = #tpu.dot_dimension_numbers<[1], [0], [0], [1], [0, 0, 1, 1], [], []>} : vector<16x8xf32>, vector<8x128xf32>, vector<16x128xf32> -> vector<16x128xf32>
    %16 = arith.addf %9, %15 : vector<16x128xf32>
    %c2 = arith.constant 2 : index
    %c0_17 = arith.constant 0 : index
    %c0_18 = arith.constant 0 : index
    %17 = vector.load %arg2[%c2, %c0_17, %c0_18] : memref<3x128x128xf32, #tpu.memory_space<vmem>>, vector<1x128x128xf32>
    %18 = vector.shape_cast %17 : vector<1x128x128xf32> to vector<128x128xf32>
    %cst_19 = arith.constant dense<0.000000e+00> : vector<8x128xf32>
    %19 = tpu.matmul %1, %18, %cst_19 {dimension_numbers = #tpu.dot_dimension_numbers<[1], [0], [0], [1], [0, 0, 1, 1], [], []>} : vector<8x128xf32>, vector<128x128xf32>, vector<8x128xf32> -> vector<8x128xf32>
    %c2_20 = arith.constant 2 : index
    %c0_21 = arith.constant 0 : index
    %c0_22 = arith.constant 0 : index
    %20 = vector.load %arg3[%c2_20, %c0_21, %c0_22] : memref<3x16x8xf32, #tpu.memory_space<vmem>>, vector<1x16x8xf32>
    %21 = vector.shape_cast %20 : vector<1x16x8xf32> to vector<16x8xf32>
    %cst_23 = arith.constant dense<0.000000e+00> : vector<16x128xf32>
    %22 = tpu.matmul %21, %19, %cst_23 {dimension_numbers = #tpu.dot_dimension_numbers<[1], [0], [0], [1], [0, 0, 1, 1], [], []>} : vector<16x8xf32>, vector<8x128xf32>, vector<16x128xf32> -> vector<16x128xf32>
    %23 = arith.addf %16, %22 : vector<16x128xf32>
    %c0_24 = arith.constant 0 : index
    %c0_25 = arith.constant 0 : index
    %24 = vector.load %arg4[%c0_24, %c0_25] : memref<16x1xf32, #tpu.memory_space<vmem>>, vector<16x1xf32>
    %25 = vector.broadcast %24 : vector<16x1xf32> to vector<16x128xf32>
    %26 = arith.mulf %23, %25 : vector<16x128xf32>
    %c0_26 = arith.constant 0 : index
    %c0_27 = arith.constant 0 : index
    %27 = vector.load %arg5[%c0_26, %c0_27] : memref<16x1xf32, #tpu.memory_space<vmem>>, vector<16x1xf32>
    %28 = vector.broadcast %27 : vector<16x1xf32> to vector<16x128xf32>
    %29 = arith.addf %26, %28 : vector<16x128xf32>
    %30 = arith.negf %29 : vector<16x128xf32>
    %31 = math.exp %30 : vector<16x128xf32>
    %cst_28 = arith.constant 1.000000e+00 : f32
    %32 = vector.broadcast %cst_28 : f32 to vector<16x128xf32>
    %33 = arith.addf %32, %31 : vector<16x128xf32>
    %34 = arith.divf %32, %33 : vector<16x128xf32>
    %cst_29 = arith.constant 0.000000e+00 : f32
    %35 = vector.broadcast %cst_29 : f32 to vector<32x128xf32>
    %c0_30 = arith.constant 0 : index
    %c0_31 = arith.constant 0 : index
    %c0_32 = arith.constant 0 : index
    %36 = vector.load %arg2[%c0_30, %c0_31, %c0_32] : memref<3x128x128xf32, #tpu.memory_space<vmem>>, vector<1x128x128xf32>
    %37 = vector.shape_cast %36 : vector<1x128x128xf32> to vector<128x128xf32>
    %cst_33 = arith.constant dense<0.000000e+00> : vector<16x128xf32>
    %38 = tpu.matmul %34, %37, %cst_33 {dimension_numbers = #tpu.dot_dimension_numbers<[1], [0], [0], [1], [0, 0, 1, 1], [], []>} : vector<16x128xf32>, vector<128x128xf32>, vector<16x128xf32> -> vector<16x128xf32>
    %c0_34 = arith.constant 0 : index
    %c0_35 = arith.constant 0 : index
    %c0_36 = arith.constant 0 : index
    %39 = vector.load %arg6[%c0_34, %c0_35, %c0_36] : memref<3x32x16xf32, #tpu.memory_space<vmem>>, vector<1x32x16xf32>
    %40 = vector.shape_cast %39 : vector<1x32x16xf32> to vector<32x16xf32>
    %cst_37 = arith.constant dense<0.000000e+00> : vector<32x128xf32>
    %41 = tpu.matmul %40, %38, %cst_37 {dimension_numbers = #tpu.dot_dimension_numbers<[1], [0], [0], [1], [0, 0, 1, 1], [], []>} : vector<32x16xf32>, vector<16x128xf32>, vector<32x128xf32> -> vector<32x128xf32>
    %42 = arith.addf %35, %41 : vector<32x128xf32>
    %c1_38 = arith.constant 1 : index
    %c0_39 = arith.constant 0 : index
    %c0_40 = arith.constant 0 : index
    %43 = vector.load %arg2[%c1_38, %c0_39, %c0_40] : memref<3x128x128xf32, #tpu.memory_space<vmem>>, vector<1x128x128xf32>
    %44 = vector.shape_cast %43 : vector<1x128x128xf32> to vector<128x128xf32>
    %cst_41 = arith.constant dense<0.000000e+00> : vector<16x128xf32>
    %45 = tpu.matmul %34, %44, %cst_41 {dimension_numbers = #tpu.dot_dimension_numbers<[1], [0], [0], [1], [0, 0, 1, 1], [], []>} : vector<16x128xf32>, vector<128x128xf32>, vector<16x128xf32> -> vector<16x128xf32>
    %c1_42 = arith.constant 1 : index
    %c0_43 = arith.constant 0 : index
    %c0_44 = arith.constant 0 : index
    %46 = vector.load %arg6[%c1_42, %c0_43, %c0_44] : memref<3x32x16xf32, #tpu.memory_space<vmem>>, vector<1x32x16xf32>
    %47 = vector.shape_cast %46 : vector<1x32x16xf32> to vector<32x16xf32>
    %cst_45 = arith.constant dense<0.000000e+00> : vector<32x128xf32>
    %48 = tpu.matmul %47, %45, %cst_45 {dimension_numbers = #tpu.dot_dimension_numbers<[1], [0], [0], [1], [0, 0, 1, 1], [], []>} : vector<32x16xf32>, vector<16x128xf32>, vector<32x128xf32> -> vector<32x128xf32>
    %49 = arith.addf %42, %48 : vector<32x128xf32>
    %c2_46 = arith.constant 2 : index
    %c0_47 = arith.constant 0 : index
    %c0_48 = arith.constant 0 : index
    %50 = vector.load %arg2[%c2_46, %c0_47, %c0_48] : memref<3x128x128xf32, #tpu.memory_space<vmem>>, vector<1x128x128xf32>
    %51 = vector.shape_cast %50 : vector<1x128x128xf32> to vector<128x128xf32>
    %cst_49 = arith.constant dense<0.000000e+00> : vector<16x128xf32>
    %52 = tpu.matmul %34, %51, %cst_49 {dimension_numbers = #tpu.dot_dimension_numbers<[1], [0], [0], [1], [0, 0, 1, 1], [], []>} : vector<16x128xf32>, vector<128x128xf32>, vector<16x128xf32> -> vector<16x128xf32>
    %c2_50 = arith.constant 2 : index
    %c0_51 = arith.constant 0 : index
    %c0_52 = arith.constant 0 : index
    %53 = vector.load %arg6[%c2_50, %c0_51, %c0_52] : memref<3x32x16xf32, #tpu.memory_space<vmem>>, vector<1x32x16xf32>
    %54 = vector.shape_cast %53 : vector<1x32x16xf32> to vector<32x16xf32>
    %cst_53 = arith.constant dense<0.000000e+00> : vector<32x128xf32>
    %55 = tpu.matmul %54, %52, %cst_53 {dimension_numbers = #tpu.dot_dimension_numbers<[1], [0], [0], [1], [0, 0, 1, 1], [], []>} : vector<32x16xf32>, vector<16x128xf32>, vector<32x128xf32> -> vector<32x128xf32>
    %56 = arith.addf %49, %55 : vector<32x128xf32>
    %c0_54 = arith.constant 0 : index
    %c0_55 = arith.constant 0 : index
    %57 = vector.load %arg7[%c0_54, %c0_55] : memref<32x1xf32, #tpu.memory_space<vmem>>, vector<32x1xf32>
    %58 = vector.broadcast %57 : vector<32x1xf32> to vector<32x128xf32>
    %59 = arith.mulf %56, %58 : vector<32x128xf32>
    %c0_56 = arith.constant 0 : index
    %c0_57 = arith.constant 0 : index
    %60 = vector.load %arg8[%c0_56, %c0_57] : memref<32x1xf32, #tpu.memory_space<vmem>>, vector<32x1xf32>
    %61 = vector.broadcast %60 : vector<32x1xf32> to vector<32x128xf32>
    %62 = arith.addf %59, %61 : vector<32x128xf32>
    %63 = arith.negf %62 : vector<32x128xf32>
    %64 = math.exp %63 : vector<32x128xf32>
    %cst_58 = arith.constant 1.000000e+00 : f32
    %65 = vector.broadcast %cst_58 : f32 to vector<32x128xf32>
    %66 = arith.addf %65, %64 : vector<32x128xf32>
    %67 = arith.divf %65, %66 : vector<32x128xf32>
    %c0_59 = arith.constant 0 : index
    %c0_60 = arith.constant 0 : index
    %c0_61 = arith.constant 0 : index
    %68 = vector.load %arg9[%c0_59, %c0_60, %c0_61] : memref<1x32x128xf32, #tpu.memory_space<vmem>>, vector<1x32x128xf32>
    %69 = vector.shape_cast %68 : vector<1x32x128xf32> to vector<32x128xf32>
    %70 = vector.shape_cast %67 : vector<32x128xf32> to vector<1x32x128xf32>
    tpu.vector_store %arg9[%c0_59, %c0_60, %c0_61], %70 {strides = array<i32>} : memref<1x32x128xf32, #tpu.memory_space<vmem>>, vector<1x32x128xf32>,
    return
  }
  func.func @transform_0(%arg0: i32) -> (i32, i32, i32) {
    %c0_i32 = arith.constant 0 : i32
    %c0_i32_0 = arith.constant 0 : i32
    %c0_i32_1 = arith.constant 0 : i32
    return %arg0, %c0_i32, %c0_i32_0 : i32, i32, i32
  }
  func.func @transform_1(%arg0: i32) -> (i32, i32, i32) {
    %c0_i32 = arith.constant 0 : i32
    %c0_i32_0 = arith.constant 0 : i32
    %c0_i32_1 = arith.constant 0 : i32
    %c0_i32_2 = arith.constant 0 : i32
    return %c0_i32, %c0_i32_0, %c0_i32_1 : i32, i32, i32
  }
  func.func @transform_2(%arg0: i32) -> (i32, i32, i32) {
    %c0_i32 = arith.constant 0 : i32
    %c0_i32_0 = arith.constant 0 : i32
    %c0_i32_1 = arith.constant 0 : i32
    %c0_i32_2 = arith.constant 0 : i32
    return %c0_i32, %c0_i32_0, %c0_i32_1 : i32, i32, i32
  }
  func.func @transform_3(%arg0: i32) -> (i32, i32) {
    %c0_i32 = arith.constant 0 : i32
    %c0_i32_0 = arith.constant 0 : i32
    %c0_i32_1 = arith.constant 0 : i32
    return %c0_i32, %c0_i32_0 : i32, i32
  }
  func.func @transform_4(%arg0: i32) -> (i32, i32) {
    %c0_i32 = arith.constant 0 : i32
    %c0_i32_0 = arith.constant 0 : i32
    %c0_i32_1 = arith.constant 0 : i32
    return %c0_i32, %c0_i32_0 : i32, i32
  }
  func.func @transform_5(%arg0: i32) -> (i32, i32, i32) {
    %c0_i32 = arith.constant 0 : i32
    %c0_i32_0 = arith.constant 0 : i32
    %c0_i32_1 = arith.constant 0 : i32
    %c0_i32_2 = arith.constant 0 : i32
    return %c0_i32, %c0_i32_0, %c0_i32_1 : i32, i32, i32
  }
  func.func @transform_6(%arg0: i32) -> (i32, i32) {
    %c0_i32 = arith.constant 0 : i32
    %c0_i32_0 = arith.constant 0 : i32
    %c0_i32_1 = arith.constant 0 : i32
    return %c0_i32, %c0_i32_0 : i32, i32
  }
  func.func @transform_7(%arg0: i32) -> (i32, i32) {
    %c0_i32 = arith.constant 0 : i32
    %c0_i32_0 = arith.constant 0 : i32
    %c0_i32_1 = arith.constant 0 : i32
    return %c0_i32, %c0_i32_0 : i32, i32
  }
  func.func @transform_8(%arg0: i32) -> (i32, i32, i32) {
    %c0_i32 = arith.constant 0 : i32
    %c0_i32_0 = arith.constant 0 : i32
    %c0_i32_1 = arith.constant 0 : i32
    return %arg0, %c0_i32, %c0_i32_0 : i32, i32, i32
  }
}

</mosaic_0001>

<bundles_post_ra>
// kernel: tpu_custom_call.1
= control target key start
LH: loop header
LB: loop body
LE: loop exit
PB: predicated region body
PF: predicated region fallthrough
CT: control target
= control target key end

     0   :  { %13 = vsyncpa [#allocation3], 0  ;;  %s2776_s0 = inlined_call_operand.vmem [shape: f32[2,8,128], index: 0, kind: input, shape index: {}]   ;;  %s2777_s1 = inlined_call_operand.hbm [shape: f32[3,128,128], index: 1, kind: input, shape index: {}]   ;;  %s2778_s2 = inlined_call_operand.vmem [shape: f32[3,16,8], index: 2, kind: input, shape index: {}]   ;;  %s2779_s3 = inlined_call_operand.vmem [shape: f32[16,1], index: 3, kind: input, shape index: {}]   ;;  %s2780_s4 = inlined_call_operand.vmem [shape: f32[16,1], index: 4, kind: input, shape index: {}]   ;;  %s2781_s5 = inlined_call_operand.vmem [shape: f32[3,32,16], index: 5, kind: input, shape index: {}]   ;;  %s2782_s6 = inlined_call_operand.vmem [shape: f32[32,1], index: 6, kind: input, shape index: {}]   ;;  %s2783_s7 = inlined_call_operand.vmem [shape: f32[32,1], index: 7, kind: input, shape index: {}]   ;;  %s2784_s8 = inlined_call_operand.hbm [shape: f32[2,32,128], index: 8, kind: output, shape index: {}]  }
   0x1   :  { %14 = vsyncpa [#allocation4], 0 }
   0x2   :  { %16 = vsyncpa [#allocation4 + $0x1], 0  ;;  %s2244_s27 = smov 0   ;;  %s2246_s28 = smov 0  }
   0x3   :  { %s2248_s29 = smov 0   ;;  %s2250_s30 = smov 0  }
   0x4 LB: > { %s2265_s9 = sadd.s32 4294967295, %s2188_s30   ;;  %s1578_s10 = sadd.s32 4294967294, %s2188_s30   ;;  %s2188_s30 = sphi %s2250_s30, %s2792_s30   ;;  %s2184_s29 = sphi %s2248_s29, %s2791_s29   ;;  %s2180_s28 = sphi %s2246_s28, %s2790_s28   ;;  %s2176_s27 = sphi %s2244_s27, %s2789_s27  }
   0x5   : > { %s2269_s11 = sadd.s32 1, %s2188_s30   ;;  %s202_s12 = sadd.s32 1, %s2184_s29 }
   0x6   : > { %s199_s13 = ssub.s32 %s2188_s30, %s2269_s11  ;;  %p212_p0 = scmp.ne.s32.totalorder %s2184_s29, %s2180_s28 }
   0x7   : > { %p200_p1 = scmp.eq.s32.totalorder %s199_s13, 0  ;;  %p213_p2 = scmp.eq.s32.totalorder %s2265_s9, 1 }
   0x8   : > { %p218_p3 = scmp.ne.s32.totalorder %s2180_s28, %s2176_s27  ;;  %p219_p4 = scmp.eq.s32.totalorder %s1578_s10, 1 }
   0x9   : > { %s2280_s14 = scalar_select %p200_p1, %s2184_s29, %s202_s12  }
   0xa   : > { %p2282_p5 = por %p213_p2, %p212_p0  ;;  %p2286_p6 = por %p219_p4, %p218_p3 }
   0xb   : > { %p1579_p7 = scmp.ge.s32.totalorder %s2188_s30, 1  ;;  %p226_p8 = scmp.lt.s32.totalorder %s2188_s30, 3 }
   0xc   : > { %s2786_s16 = scalar_select %p2286_p6, 1, 0 }
   0xd   : > { %p2029_p9 = scmp.eq.s32.totalorder %s2265_s9, 0  ;;  %p2293_p10 = pnand %p1579_p7, %p226_p8 }
   0xe   : > { %s2190_s18 = smov [#allocation2]  }
   0xf   : > { %s238_s19 = sshll.u32 %s2190_s18, 4  ;;  %p2021_p11 = pneg %p2293_p10  ;;  %s239_s19 = int_to_ptr.vmem [resolvable:$true] %s238_s19 }
  0x10   : > { %s2109_s20 = scalar_lea.vmem %s239_s19, 6144  ;;  %p2117_p3 = scmp.lt.s32.totalorder %s239_s19, %s239_s19 }
  0x11   : > { %p2022_p12 = pnand %p2029_p9, %p2021_p11  ;;  %p2110_p0 = scmp.ne.s32.totalorder %s239_s19, %s2109_s20 }
  0x12   : > { %p2118_p4 = scmp.lt.s32.totalorder %s2109_s20, %s2109_s20 }
  0x13   : > { %p2100_p13 = pneg %p2022_p12 }
  0x14   : > { %p2119_p6 = por %p2118_p4, %p2117_p3 }
  0x15   : > { %p2112_p1 = pnand %p2110_p0, %p2100_p13 }
  0x17   : > { %p2113_p2 = pneg %p2112_p1 }
  0x19   : > { %p2120_p7 = pnand %p2119_p6, %p2113_p2 }
  0x1b   : > { %2123 = shalt.err (!%p2120_p7)
}
  0x1c   : > { %s2191_s21 = smov 128   ;;  %s2192_s22 = smov 8  }
  0x1d   : > { %2024 = dma.hbm_to_vmem [thread:$0]  (!%p2022_p12), %s2777_s1, 6144, %s239_s19, [#allocation3], %s2191_s21, %s2191_s21, %s2192_s22  }
  0x1e   : > { %279 = sbr.rel (%p2293_p10) target bundleno = 1415 (0x587), region = 52 }
  0x23   : > { %2167 = dma.done.wait (%p2029_p9), [#allocation3], 6144  }
  0x24   : > { %2169 = vsyncadd (%p2029_p9), [#allocation3], 4294961152  ;;  %v2193_v0 = vmov 0.0   ;;  %vm2194_vm0 = vmmov 0   ;;  %v2316_v1 = vld [vmem:[#allocation2 + $0xf8] sm:$0xff]  ;;  %v2320_v3 = vld [vmem:[#allocation2 + $0xf0] sm:$0xff] }
  0x25   : > { %1795 = vmatprep.subr.mxu1 %v2193_v0  ;;  %1760 = vmatprep.subr.mxu0 %v2193_v0  ;;  %v2318_v2 = vld [vmem:[#allocation2 + $0x78] sm:$0xff]  ;;  %v2324_v4 = vld [vmem:[#allocation2 + $0x70] sm:$0xff]  ;;  %v2328_v5 = vld [vmem:[#allocation2 + $0xe8] sm:$0xff]  ;;  %p312_p6 = scmp.lt.s32.totalorder %s2265_s9, 1  ;;  %vm495_vm1 = vcmask 64512   ;;  %v2195_v61 = vmov 0  }
  0x26   : > { %1827 = vmatprep.mubr.msk.f32.mxu1 %vm2194_vm0, %v2193_v0  ;;  %1792 = vmatprep.mubr.msk.f32.mxu0 %vm2194_vm0, %v2193_v0  ;;  %v2330_v6 = vld [vmem:[#allocation2 + $0x68] sm:$0xff]  ;;  %v2336_v7 = vld [vmem:[#allocation2 + $0xe0] sm:$0xff]  ;;  %v2344_v9 = vld [vmem:[#allocation2 + $0xd8] sm:$0xff]  ;;  %vm1030_vm2 = vcmask 130048   ;;  %s1627_s12 = sshll.u32 %s2265_s9, 9  ;;  %s2196_s21 = smov [#allocation5]  }
  0x27   : > { %1796 = vmatpush3.msra.mxu1 %v2316_v1  ;;  %1761 = vmatpush3.msra.mxu0 %v2318_v2  ;;  %v2338_v8 = vld [vmem:[#allocation2 + $0x60] sm:$0xff]  ;;  %v2346_v10 = vld [vmem:[#allocation2 + $0x58] sm:$0xff]  ;;  %v2352_v11 = vld [vmem:[#allocation2 + $0xd0] sm:$0xff]  ;;  %s313_s25 = scalar_select %p312_p6, %s2265_s9, 1 }
  0x28   : > { %1797 = vmatprep.subr.mxu1 %v2193_v0  ;;  %1762 = vmatprep.subr.mxu0 %v2193_v0  ;;  %v2354_v12 = vld [vmem:[#allocation2 + $0x50] sm:$0xff]  ;;  %v2360_v13 = vld [vmem:[#allocation2 + $0xc8] sm:$0xff]  ;;  %v2368_v15 = vld [vmem:[#allocation2 + $0xc0] sm:$0xff]  ;;  %s2732_s19 = scalar_lea.hbm %s2784_s8, %s1627_s12  ;;  %s2128_s22 = sshll.u32 %s2196_s21, 4  ;;  %s2129_s22 = int_to_ptr.vmem [resolvable:$false] %s2128_s22 }
  0x29   : > { %1798 = vmatpush3.msra.mxu1 %v2320_v3  ;;  %1763 = vmatpush3.msra.mxu0 %v2324_v4  ;;  %v2362_v14 = vld [vmem:[#allocation2 + $0x48] sm:$0xff]  ;;  %v2370_v16 = vld [vmem:[#allocation2 + $0x40] sm:$0xff]  ;;  %v2376_v17 = vld [vmem:[#allocation2 + $0xb8] sm:$0xff]  ;;  %s1585_s26 = sshll.u32 %s313_s25, 3  ;;  %s309_s25 = sand.u32 1, %s2180_s28  }
  0x2a   : > { %1799 = vmatprep.subr.mxu1 %v2193_v0  ;;  %1764 = vmatprep.subr.mxu0 %v2193_v0  ;;  %v2378_v18 = vld [vmem:[#allocation2 + $0x38] sm:$0xff]  ;;  %v2385_v19 = vld [vmem:[#allocation2 + $0xb0] sm:$0xff]  ;;  %v2393_v21 = vld [vmem:[#allocation2 + $0xa8] sm:$0xff]  ;;  %s315_s13 = scalar_lea.vmem %s2776_s0, %s1585_s26  ;;  %s1584_s26 = sshll.u32 %s309_s25, 5 }
  0x2b   : > { %1800 = vmatpush3.msra.mxu1 %v2328_v5  ;;  %1765 = vmatpush3.msra.mxu0 %v2330_v6  ;;  %v2387_v20 = vld [vmem:[#allocation2 + $0x30] sm:$0xff]  ;;  %v2395_v22 = vld [vmem:[#allocation2 + $0x28] sm:$0xff]  ;;  %v2402_v23 = vld [vmem:[#allocation2 + $0xa0] sm:$0xff]  ;;  %s311_s10 = scalar_lea.vmem [#allocation5], %s1584_s26  ;;  %s2736_s20 = scalar_lea.sflag [#allocation4], %s309_s25 }
  0x2c   : > { %1801 = vmatprep.subr.mxu1 %v2193_v0  ;;  %1766 = vmatprep.subr.mxu0 %v2193_v0  ;;  %v2404_v24 = vld [vmem:[#allocation2 + $0x20] sm:$0xff]  ;;  %v2410_v25 = vld [vmem:[#allocation2 + $0x98] sm:$0xff]  ;;  %v2418_v27 = vld [vmem:[#allocation2 + $0x90] sm:$0xff]  ;;  %s2130_s23 = scalar_lea.vmem %s2129_s22, 1024 }
  0x2d   : > { %1802 = vmatpush3.msra.mxu1 %v2336_v7  ;;  %1767 = vmatpush3.msra.mxu0 %v2338_v8  ;;  %v2412_v26 = vld [vmem:[#allocation2 + $0x18] sm:$0xff]  ;;  %v2420_v28 = vld [vmem:[#allocation2 + $0x10] sm:$0xff]  ;;  %v2426_v29 = vld [vmem:[#allocation2 + $0x88] sm:$0xff] }
  0x2e   : > { %1803 = vmatprep.subr.mxu1 %v2193_v0  ;;  %1768 = vmatprep.subr.mxu0 %v2193_v0  ;;  %v2428_v30 = vld [vmem:[#allocation2 + $0x8] sm:$0xff]  ;;  %v2437_v31 = vld [vmem:[#allocation2 + $0x80] sm:$0xff]  ;;  %v1586_v34 = vld [vmem:[%s2778_s2 + $0x10] sm:$0xff] }
  0x2f   : > { %1804 = vmatpush3.msra.mxu1 %v2344_v9  ;;  %1769 = vmatpush3.msra.mxu0 %v2346_v10  ;;  %v2439_v32 = vld [vmem:[#allocation2] sm:$0xff]  ;;  %v1587_v37 = vld [vmem:[%s2778_s2 + $0x18] sm:$0xff]  ;;  %v404_v41 = vld [vmem:[%s2778_s2 + $0x8] sm:$0xff] }
  0x30   : > { %1805 = vmatprep.subr.mxu1 %v2193_v0  ;;  %1770 = vmatprep.subr.mxu0 %v2193_v0  ;;  %v2443_v33 = vld [vmem:[%s315_s13] sm:$0xff]  ;;  %v2467_v42 = vld [vmem:[#allocation2 + $0x178] sm:$0xff]  ;;  %v2470_v43 = vld [vmem:[#allocation2 + $0x170] sm:$0xff]  ;;  %s1504_s13 = sshll.u32 %s311_s10, 4  ;;  %s2734_s13 = int_to_ptr.vmem [resolvable:$true] %s1504_s13 }
  0x31   : > { %1806 = vmatpush3.msra.mxu1 %v2352_v11  ;;  %1771 = vmatpush3.msra.mxu0 %v2354_v12  ;;  %v403_v38 = vld [vmem:[%s2778_s2] sm:$0xff]  ;;  %v2476_v44 = vld [vmem:[#allocation2 + $0x168] sm:$0xff]  ;;  %v2484_v46 = vld [vmem:[#allocation2 + $0x158] sm:$0xff]  ;;  %s2124_s9 = scalar_lea.vmem %s2734_s13, 512  ;;  %p2131_p11 = scmp.lt.s32.totalorder %s2734_s13, %s2129_s22 }
  0x32   : > { %1807 = vmatprep.subr.mxu1 %v2193_v0  ;;  %1772 = vmatprep.subr.mxu0 %v2193_v0  ;;  %v2480_v45 = vld [vmem:[#allocation2 + $0x160] sm:$0xff]  ;;  %v2488_v47 = vld [vmem:[#allocation2 + $0x150] sm:$0xff]  ;;  %v2492_v48 = vld [vmem:[#allocation2 + $0x148] sm:$0xff]  ;;  %p2125_p8 = scmp.ne.s32.totalorder %s2734_s13, %s2124_s9  ;;  %p2132_p12 = scmp.lt.s32.totalorder %s2130_s23, %s2124_s9 }
  0x33   : > { %1808 = vmatpush3.msra.mxu1 %v2360_v13  ;;  %1773 = vmatpush3.msra.mxu0 %v2362_v14  ;;  %v2496_v49 = vld [vmem:[#allocation2 + $0x140] sm:$0xff]  ;;  %v2500_v50 = vld [vmem:[#allocation2 + $0x138] sm:$0xff]  ;;  %v2504_v51 = vld [vmem:[#allocation2 + $0x130] sm:$0xff] }
  0x34   : > { %1809 = vmatprep.subr.mxu1 %v2193_v0  ;;  %1774 = vmatprep.subr.mxu0 %v2193_v0  ;;  %v2508_v52 = vld [vmem:[#allocation2 + $0x128] sm:$0xff]  ;;  %v2512_v53 = vld [vmem:[#allocation2 + $0x120] sm:$0xff]  ;;  %v2516_v54 = vld [vmem:[#allocation2 + $0x118] sm:$0xff]  ;;  %p2126_p9 = pnand %p2125_p8, %p2282_p5  ;;  %p2133_p13 = por %p2132_p12, %p2131_p11 }
  0x35   : > { %1810 = vmatpush3.msra.mxu1 %v2368_v15  ;;  %1775 = vmatpush3.msra.mxu0 %v2370_v16  ;;  %v2520_v55 = vld [vmem:[#allocation2 + $0x110] sm:$0xff]  ;;  %v2524_v56 = vld [vmem:[#allocation2 + $0x108] sm:$0xff]  ;;  %v2528_v57 = vld [vmem:[#allocation2 + $0x100] sm:$0xff] }
  0x36   : > { %1811 = vmatprep.subr.mxu1 %v2193_v0  ;;  %1776 = vmatprep.subr.mxu0 %v2193_v0  ;;  %v1592_v58 = vld [vmem:[%s2778_s2 + $0x20] sm:$0xff]  ;;  %v832_v62 = vld [vmem:[%s2779_s3 + $0x8] sm:$0xff]  ;;  %p2127_p10 = pneg %p2126_p9 }
  0x37   : > { %1812 = vmatpush3.msra.mxu1 %v2376_v17  ;;  %1777 = vmatpush3.msra.mxu0 %v2378_v18  ;;  %v831_v59 = vld [vmem:[%s2779_s3] sm:$0xff]  ;;  %v846_v63 = vld [vmem:[%s2780_s4 + $0x8] sm:$0xff] }
  0x38   : > { %1813 = vmatprep.subr.mxu1 %v2193_v0  ;;  %1778 = vmatprep.subr.mxu0 %v2193_v0  ;;  %v845_v60 = vld [vmem:[%s2780_s4] sm:$0xff]  ;;  %p2134_p0 = pnand %p2133_p13, %p2127_p10 }
  0x39   : > { %1814 = vmatpush3.msra.mxu1 %v2385_v19  ;;  %1779 = vmatpush3.msra.mxu0 %v2387_v20 }
  0x3a   : > { %1815 = vmatprep.subr.mxu1 %v2193_v0  ;;  %1780 = vmatprep.subr.mxu0 %v2193_v0 }
  0x3b   : > { %1816 = vmatpush3.msra.mxu1 %v2393_v21  ;;  %1781 = vmatpush3.msra.mxu0 %v2395_v22 }
  0x3c   : > { %1817 = vmatprep.subr.mxu1 %v2193_v0  ;;  %1782 = vmatprep.subr.mxu0 %v2193_v0 }
  0x3d   : > { %1818 = vmatpush3.msra.mxu1 %v2402_v23  ;;  %1783 = vmatpush3.msra.mxu0 %v2404_v24 }
  0x3e   : > { %1819 = vmatprep.subr.mxu1 %v2193_v0  ;;  %1784 = vmatprep.subr.mxu0 %v2193_v0 }
  0x3f   : > { %1820 = vmatpush3.msra.mxu1 %v2410_v25  ;;  %1785 = vmatpush3.msra.mxu0 %v2412_v26 }
  0x40   : > { %1821 = vmatprep.subr.mxu1 %v2193_v0  ;;  %1786 = vmatprep.subr.mxu0 %v2193_v0 }
  0x41   : > { %1822 = vmatpush3.msra.mxu1 %v2418_v27  ;;  %1787 = vmatpush3.msra.mxu0 %v2420_v28 }
  0x42   : > { %1823 = vmatprep.subr.mxu1 %v2193_v0  ;;  %1788 = vmatprep.subr.mxu0 %v2193_v0 }
  0x43   : > { %1824 = vmatpush3.msra.mxu1 %v2426_v29  ;;  %1789 = vmatpush3.msra.mxu0 %v2428_v30 }
  0x44   : > { %1825 = vmatprep.subr.mxu1 %v2193_v0  ;;  %1790 = vmatprep.subr.mxu0 %v2193_v0 }
  0x45   : > { %1826 = vmatpush3.msra.mxu1 %v2437_v31  ;;  %1791 = vmatpush3.msra.mxu0 %v2439_v32 }
  0x46   : > { %1828 = vmatmul.mubr.f32.vlgmr.msra.gmra.mxu1 %v2443_v33  ;;  %1793 = vmatmul.mubr.f32.vlgmr.msra.gmra.mxu0 %v2443_v33 }
  0x47   : > { %1832 = vmatprep.mubr.msk.f32.mxu0 %vm495_vm1, %v1586_v34  ;;  %1877 = vmatprep.mubr.msk.f32.mxu1 %vm495_vm1, %v1592_v58  ;;  %v1600_v58 = vld [vmem:[%s2781_s5 + $0x30] sm:$0xff] }
  0x48   : > { %2072 = vset.pattern.permute.xlu0 %v2195_v61  ;;  %2073 = vset.pattern.permute.xlu1 %v2195_v61  ;;  %v946_v61 = vld [vmem:[%s2781_s5] sm:$0xff] }
  0x49   : > { %835 = vperm.xlu0 %2072, %v831_v59   ;;  %849 = vperm.xlu1 %2073, %v845_v60   ;;  %v1601_v60 = vld [vmem:[%s2781_s5 + $0x38] sm:$0xff] }
  0x4d   : > { %840 = vperm.xlu0 %2072, %v832_v62   ;;  %854 = vperm.xlu1 %2073, %v846_v63   ;;  %v947_v62 = vld [vmem:[%s2781_s5 + $0x8] sm:$0xff]  ;;  %v948_v63 = vld [vmem:[%s2781_s5 + $0x10] sm:$0xff] }
 0x106   : > { %v488_v35 = vpop.f32.mrf.mxu1  ;;  %v399_v36 = vpop.f32.mrf.mxu0 }
 0x107   : > { %1830 = vmatprep.subr.mxu0 %v488_v35 }
 0x108   : > { %v1829_v39 = vpop.f32.mrf.mxu1  ;;  %1831 = vmatpush3.msra.mxu0 %v488_v35  ;;  %v1794_v40 = vpop.f32.mrf.mxu0 }
 0x109   : > { %1833 = vmatmul.mubr.msk.f32.vlgmr.msra.gmra.mxu0 %vm495_vm1, %v1587_v37  ;;  %1835 = vmatprep.subr.mxu0 %v399_v36  ;;  %v1598_v37 = vld [vmem:[%s2781_s5 + $0x20] sm:$0xff] }
 0x10a   : > { %1836 = vmatpush3.msra.mxu0 %v399_v36  ;;  %1837 = vmatprep.mubr.msk.f32.mxu0 %vm495_vm1, %v403_v38 }
 0x10b   : > { %1840 = vmatprep.subr.mxu0 %v2193_v0 }
 0x10d   : > { %1838 = vmatmul.mubr.msk.f32.vlgmr.msra.gmra.mxu0 %vm495_vm1, %v404_v41  ;;  %v1599_v41 = vld [vmem:[%s2781_s5 + $0x28] sm:$0xff] }
 0x10e   : > { %1841 = vmatpush3.msra.mxu0 %v2467_v42  ;;  %1872 = vmatprep.mubr.msk.f32.mxu0 %vm2194_vm0, %v2193_v0 }
 0x10f   : > { %1842 = vmatprep.subr.mxu0 %v2193_v0 }
 0x110   : > { %1843 = vmatpush3.msra.mxu0 %v2470_v43 }
 0x111   : > { %1844 = vmatprep.subr.mxu0 %v2193_v0 }
 0x112   : > { %1845 = vmatpush3.msra.mxu0 %v2476_v44 }
 0x113   : > { %1846 = vmatprep.subr.mxu0 %v2193_v0 }
 0x114   : > { %1847 = vmatpush3.msra.mxu0 %v2480_v45 }
 0x115   : > { %1848 = vmatprep.subr.mxu0 %v2193_v0 }
 0x116   : > { %1849 = vmatpush3.msra.mxu0 %v2484_v46 }
 0x117   : > { %1850 = vmatprep.subr.mxu0 %v2193_v0 }
 0x118   : > { %1851 = vmatpush3.msra.mxu0 %v2488_v47 }
 0x119   : > { %1852 = vmatprep.subr.mxu0 %v2193_v0 }
 0x11a   : > { %1853 = vmatpush3.msra.mxu0 %v2492_v48 }
 0x11b   : > { %1854 = vmatprep.subr.mxu0 %v2193_v0 }
 0x11c   : > { %1855 = vmatpush3.msra.mxu0 %v2496_v49 }
 0x11d   : > { %1856 = vmatprep.subr.mxu0 %v2193_v0 }
 0x11e   : > { %1857 = vmatpush3.msra.mxu0 %v2500_v50 }
 0x11f   : > { %1858 = vmatprep.subr.mxu0 %v2193_v0 }
 0x120   : > { %1859 = vmatpush3.msra.mxu0 %v2504_v51 }
 0x121   : > { %1860 = vmatprep.subr.mxu0 %v2193_v0 }
 0x122   : > { %1861 = vmatpush3.msra.mxu0 %v2508_v52 }
 0x123   : > { %1862 = vmatprep.subr.mxu0 %v2193_v0 }
 0x124   : > { %1863 = vmatpush3.msra.mxu0 %v2512_v53 }
 0x125   : > { %1864 = vmatprep.subr.mxu0 %v2193_v0 }
 0x126   : > { %1865 = vmatpush3.msra.mxu0 %v2516_v54 }
 0x127   : > { %1866 = vmatprep.subr.mxu0 %v2193_v0 }
 0x128   : > { %1867 = vmatpush3.msra.mxu0 %v2520_v55 }
 0x129   : > { %1868 = vmatprep.subr.mxu0 %v2193_v0 }
 0x12a   : > { %1869 = vmatpush3.msra.mxu0 %v2524_v56 }
 0x12b   : > { %1870 = vmatprep.subr.mxu0 %v2193_v0  ;;  %v1406_v0 = vld [vmem:[%s2782_s6] sm:$0xff] }
 0x12c   : > { %1871 = vmatpush3.msra.mxu0 %v2528_v57  ;;  %1412 = vperm.xlu0 %2072, %v1406_v0   ;;  %v949_v0 = vld [vmem:[%s2781_s5 + $0x18] sm:$0xff] }
 0x12d   : > { %1873 = vmatmul.mubr.f32.vlgmr.msra.gmra.mxu0 %v2443_v33  ;;  %1915 = vmatprep.subr.mxu0 %v2316_v1 }
 0x12e   : > { %1916 = vmatpush3.msra.mxu0 %v2316_v1  ;;  %v1407_v1 = vld [vmem:[%s2782_s6 + $0x8] sm:$0xff] }
 0x12f   : > { %1917 = vmatprep.subr.mxu0 %v2320_v3  ;;  %1417 = vperm.xlu1 %2073, %v1407_v1   ;;  %v1612_v1 = vld [vmem:[%s2781_s5 + $0x50] sm:$0xff] }
 0x130   : > { %1918 = vmatpush3.msra.mxu0 %v2320_v3  ;;  %v1408_v3 = vld [vmem:[%s2782_s6 + $0x10] sm:$0xff] }
 0x131   : > { %1919 = vmatprep.subr.mxu0 %v2328_v5  ;;  %1422 = vperm.xlu0 %2072, %v1408_v3   ;;  %v1613_v3 = vld [vmem:[%s2781_s5 + $0x58] sm:$0xff] }
 0x132   : > { %1920 = vmatpush3.msra.mxu0 %v2328_v5  ;;  %v1409_v5 = vld [vmem:[%s2782_s6 + $0x18] sm:$0xff] }
 0x133   : > { %1921 = vmatprep.subr.mxu0 %v2336_v7  ;;  %1427 = vperm.xlu1 %2073, %v1409_v5  }
 0x134   : > { %1922 = vmatpush3.msra.mxu0 %v2336_v7  ;;  %v1434_v7 = vld [vmem:[%s2783_s7] sm:$0xff] }
 0x135   : > { %1923 = vmatprep.subr.mxu0 %v2344_v9  ;;  %1440 = vperm.xlu0 %2072, %v1434_v7  }
 0x136   : > { %1924 = vmatpush3.msra.mxu0 %v2344_v9  ;;  %v1435_v9 = vld [vmem:[%s2783_s7 + $0x8] sm:$0xff] }
 0x137   : > { %1925 = vmatprep.subr.mxu0 %v2352_v11  ;;  %1445 = vperm.xlu1 %2073, %v1435_v9  }
 0x138   : > { %1926 = vmatpush3.msra.mxu0 %v2352_v11  ;;  %v1436_v11 = vld [vmem:[%s2783_s7 + $0x10] sm:$0xff] }
 0x139   : > { %1927 = vmatprep.subr.mxu0 %v2360_v13  ;;  %1450 = vperm.xlu0 %2072, %v1436_v11  }
 0x13a   : > { %1928 = vmatpush3.msra.mxu0 %v2360_v13  ;;  %v1437_v13 = vld [vmem:[%s2783_s7 + $0x18] sm:$0xff] }
 0x13b   : > { %1929 = vmatprep.subr.mxu0 %v2368_v15  ;;  %1455 = vperm.xlu1 %2073, %v1437_v13  }
 0x13c   : > { %1930 = vmatpush3.msra.mxu0 %v2368_v15 }
 0x13d   : > { %1931 = vmatprep.subr.mxu0 %v2376_v17 }
 0x13e   : > { %1932 = vmatpush3.msra.mxu0 %v2376_v17 }
 0x13f   : > { %1933 = vmatprep.subr.mxu0 %v2385_v19 }
 0x140   : > { %1934 = vmatpush3.msra.mxu0 %v2385_v19 }
 0x141   : > { %1935 = vmatprep.subr.mxu0 %v2393_v21 }
 0x142   : > { %1936 = vmatpush3.msra.mxu0 %v2393_v21 }
 0x143   : > { %1937 = vmatprep.subr.mxu0 %v2402_v23 }
 0x144   : > { %1938 = vmatpush3.msra.mxu0 %v2402_v23 }
 0x145   : > { %1939 = vmatprep.subr.mxu0 %v2410_v25 }
 0x146   : > { %1940 = vmatpush3.msra.mxu0 %v2410_v25 }
 0x147   : > { %1941 = vmatprep.subr.mxu0 %v2418_v27 }
 0x148   : > { %1942 = vmatpush3.msra.mxu0 %v2418_v27 }
 0x149   : > { %1943 = vmatprep.subr.mxu0 %v2426_v29 }
 0x14a   : > { %1944 = vmatpush3.msra.mxu0 %v2426_v29  ;;  %v1593_v29 = vld [vmem:[%s2778_s2 + $0x28] sm:$0xff] }
 0x14b   : > { %1945 = vmatprep.subr.mxu0 %v2437_v31 }
 0x14c   : > { %1946 = vmatpush3.msra.mxu0 %v2437_v31 }
 0x1c9   : > { %v1834_v15 = vpop.f32.mrf.mxu0 }
 0x1cb   : > { %v568_v17 = vpop.f32.mrf.mxu0 }
 0x1cd   : > { %v1839_v19 = vpop.f32.mrf.mxu0 }
 0x1ce   : > { %v655_v21 = vadd.f32 %v1839_v19, %v1834_v15 }
 0x1cf   : > { %v649_v23 = vpop.f32.mrf.mxu0 }
 0x1d0   : > { %v650_v25 = vadd.f32 %v649_v23, %v568_v17 }
 0x1ed   : > { %v741_v27 = vpop.f32.mrf.mxu0 }
 0x1ee   : > { %1875 = vmatprep.subr.mxu1 %v741_v27 }
 0x1ef   : > { %v1874_v31 = vpop.f32.mrf.mxu0  ;;  %1876 = vmatpush3.msra.mxu1 %v741_v27 }
 0x1f0   : > { %1878 = vmatmul.mubr.msk.f32.vlgmr.msra.gmra.mxu1 %vm495_vm1, %v1593_v29  ;;  %1880 = vmatprep.subr.mxu1 %v2318_v2 }
 0x1f1   : > { %1881 = vmatpush3.msra.mxu1 %v2318_v2  ;;  %v836_v2 = vpop.permute.xlu0 %835 }
 0x1f2   : > { %1882 = vmatprep.subr.mxu1 %v2324_v4 }
 0x1f3   : > { %1883 = vmatpush3.msra.mxu1 %v2324_v4  ;;  %v850_v4 = vpop.permute.xlu1 %849 }
 0x1f4   : > { %1884 = vmatprep.subr.mxu1 %v2330_v6 }
 0x1f5   : > { %1885 = vmatpush3.msra.mxu1 %v2330_v6 }
 0x1f6   : > { %1886 = vmatprep.subr.mxu1 %v2338_v8 }
 0x1f7   : > { %1887 = vmatpush3.msra.mxu1 %v2338_v8 }
 0x1f8   : > { %1888 = vmatprep.subr.mxu1 %v2346_v10 }
 0x1f9   : > { %1889 = vmatpush3.msra.mxu1 %v2346_v10  ;;  %v841_v10 = vpop.permute.xlu0 %840 }
 0x1fa   : > { %1890 = vmatprep.subr.mxu1 %v2354_v12 }
 0x1fb   : > { %1891 = vmatpush3.msra.mxu1 %v2354_v12 }
 0x1fc   : > { %1892 = vmatprep.subr.mxu1 %v2362_v14 }
 0x1fd   : > { %1893 = vmatpush3.msra.mxu1 %v2362_v14  ;;  %v1413_v7 = vpop.permute.xlu0 %1412 }
 0x1fe   : > { %1894 = vmatprep.subr.mxu1 %v2370_v16 }
 0x1ff   : > { %1895 = vmatpush3.msra.mxu1 %v2370_v16 }
 0x200   : > { %1896 = vmatprep.subr.mxu1 %v2378_v18 }
 0x201   : > { %1897 = vmatpush3.msra.mxu1 %v2378_v18  ;;  %v855_v18 = vpop.permute.xlu1 %854  ;;  %v1423_v11 = vpop.permute.xlu0 %1422 }
 0x202   : > { %1898 = vmatprep.subr.mxu1 %v2387_v20 }
 0x203   : > { %1899 = vmatpush3.msra.mxu1 %v2387_v20 }
 0x204   : > { %1900 = vmatprep.subr.mxu1 %v2395_v22 }
 0x205   : > { %1901 = vmatpush3.msra.mxu1 %v2395_v22  ;;  %v1418_v5 = vpop.permute.xlu1 %1417 }
 0x206   : > { %1902 = vmatprep.subr.mxu1 %v2404_v24 }
 0x207   : > { %1903 = vmatpush3.msra.mxu1 %v2404_v24 }
 0x208   : > { %1904 = vmatprep.subr.mxu1 %v2412_v26 }
 0x209   : > { %1905 = vmatpush3.msra.mxu1 %v2412_v26  ;;  %v1428_v9 = vpop.permute.xlu1 %1427 }
 0x20a   : > { %1906 = vmatprep.subr.mxu1 %v2420_v28 }
 0x20b   : > { %1907 = vmatpush3.msra.mxu1 %v2420_v28 }
 0x20c   : > { %1908 = vmatprep.subr.mxu1 %v2428_v30 }
 0x20d   : > { %1909 = vmatpush3.msra.mxu1 %v2428_v30  ;;  %v1446_v17 = vpop.permute.xlu1 %1445 }
 0x20e   : > { %1910 = vmatprep.subr.mxu1 %v2439_v32 }
 0x20f   : > { %1911 = vmatpush3.msra.mxu1 %v2439_v32 }
 0x2b0   : > { %v1879_v6 = vpop.f32.mrf.mxu1 }
 0x2b1   : > { %v830_v8 = vadd.f32 %v1879_v6, %v655_v21 }
 0x2b2   : > { %v820_v12 = vpop.f32.mrf.mxu1 }
 0x2b3   : > { %v844_v14 = vmul.f32 %v841_v10, %v830_v8  ;;  %v829_v16 = vadd.f32 %v820_v12, %v650_v25  ;;  %v1441_v25 = vpop.permute.xlu0 %1440 }
 0x2b5   : > { %v858_v20 = vadd.f32 %v855_v18, %v844_v14  ;;  %v843_v22 = vmul.f32 %v836_v2, %v829_v16  ;;  %v1456_v14 = vpop.permute.xlu1 %1455 }
 0x2b7   : > { %v1597_v24 = vmul.f32 -1.442695, %v858_v20  ;;  %v857_v26 = vadd.f32 %v850_v4, %v843_v22  ;;  %v1451_v22 = vpop.permute.xlu0 %1450 }
 0x2b9   : > { %2074 = vpow2.f32 %v1597_v24  ;;  %v1596_v28 = vmul.f32 -1.442695, %v857_v26 }
 0x2bb   : > { %2076 = vpow2.f32 %v1596_v28 }
 0x2c6   : > { %v2075_v30 = vpop.eup %2074 }
 0x2c7   : > { %v866_v34 = vadd.f32 1.0, %v2075_v30 }
 0x2c8   : > { %v2077_v33 = vpop.eup %2076 }
 0x2c9   : > { %v865_v32 = vadd.f32 1.0, %v2077_v33 }
 0x2cb   : > { %2078 = vrcp.f32 %v865_v32 }
 0x2cc   : > { %2080 = vrcp.f32 %v866_v34 }
 0x2d8   : > { %v2079_v35 = vpop.eup %2078 }
 0x2d9   : > { %v2642_v36 = vpop.eup %2080  ;;  %1912 = vmatprep.mubr.f32.mxu1 %v2079_v35  ;;  %1947 = vmatprep.mubr.f32.mxu0 %v2079_v35 }
 0x2da   : > { %1913 = vmatmul.mubr.f32.vlgmr.msra.gmra.mxu1 %v2642_v36  ;;  %1948 = vmatmul.mubr.f32.vlgmr.msra.gmra.mxu0 %v2642_v36 }
 0x2db   : > { %1954 = vmatprep.mubr.msk.f32.mxu1 %vm1030_vm2, %v1598_v37 }
 0x39a   : > { %v1949_v38 = vpop.f32.mrf.mxu0  ;;  %v1914_v39 = vpop.f32.mrf.mxu1 }
 0x39b   : > { %1950 = vmatprep.subr.mxu1 %v1949_v38 }
 0x39c   : > { %v1016_v40 = vpop.f32.mrf.mxu0  ;;  %1951 = vmatpush3.msra.mxu1 %v1949_v38  ;;  %v937_v59 = vpop.f32.mrf.mxu1 }
 0x39d   : > { %1952 = vmatprep.subr.mxu1 %v1016_v40 }
 0x39e   : > { %1953 = vmatpush3.msra.mxu1 %v1016_v40 }
 0x39f   : > { %1955 = vmatmul.mubr.msk.f32.vlgmr.msra.gmra.mxu1 %vm1030_vm2, %v1599_v41  ;;  %1960 = vmatprep.subr.mxu1 %v1914_v39 }
 0x3a0   : > { %1961 = vmatpush3.msra.mxu1 %v1914_v39  ;;  %1957 = vmatprep.mubr.msk.f32.mxu1 %vm1030_vm2, %v1600_v58 }
 0x3a1   : > { %1962 = vmatprep.subr.mxu1 %v937_v59 }
 0x3a2   : > { %1963 = vmatpush3.msra.mxu1 %v937_v59 }
 0x3a3   : > { %1958 = vmatmul.mubr.msk.f32.gmra.mxu1 %vm1030_vm2, %v1601_v60  ;;  %1970 = vmatprep.subr.mxu1 %v2467_v42 }
 0x3a4   : > { %1964 = vmatprep.mubr.msk.f32.mxu1 %vm1030_vm2, %v946_v61 }
 0x3a7   : > { %1965 = vmatmul.mubr.msk.f32.vlgmr.msra.gmra.mxu1 %vm1030_vm2, %v947_v62 }
 0x3a8   : > { %1971 = vmatpush3.msra.mxu1 %v2467_v42  ;;  %1967 = vmatprep.mubr.msk.f32.mxu1 %vm1030_vm2, %v948_v63  ;;  %v1610_v42 = vld [vmem:[%s2781_s5 + $0x40] sm:$0xff] }
 0x3a9   : > { %1972 = vmatprep.subr.mxu1 %v2470_v43  ;;  %2009 = vmatprep.mubr.msk.f32.mxu0 %vm1030_vm2, %v1610_v42 }
 0x3aa   : > { %1973 = vmatpush3.msra.mxu1 %v2470_v43 }
 0x3ab   : > { %1974 = vmatprep.subr.mxu1 %v2476_v44  ;;  %1968 = vmatmul.mubr.msk.f32.gmra.mxu1 %vm1030_vm2, %v949_v0 }
 0x3ac   : > { %1975 = vmatpush3.msra.mxu1 %v2476_v44  ;;  %2002 = vmatprep.mubr.f32.mxu1 %v2079_v35 }
 0x3ad   : > { %1976 = vmatprep.subr.mxu1 %v2480_v45 }
 0x3ae   : > { %1977 = vmatpush3.msra.mxu1 %v2480_v45 }
 0x3af   : > { %1978 = vmatprep.subr.mxu1 %v2484_v46 }
 0x3b0   : > { %1979 = vmatpush3.msra.mxu1 %v2484_v46 }
 0x3b1   : > { %1980 = vmatprep.subr.mxu1 %v2488_v47 }
 0x3b2   : > { %1981 = vmatpush3.msra.mxu1 %v2488_v47 }
 0x3b3   : > { %1982 = vmatprep.subr.mxu1 %v2492_v48 }
 0x3b4   : > { %1983 = vmatpush3.msra.mxu1 %v2492_v48 }
 0x3b5   : > { %1984 = vmatprep.subr.mxu1 %v2496_v49 }
 0x3b6   : > { %1985 = vmatpush3.msra.mxu1 %v2496_v49 }
 0x3b7   : > { %1986 = vmatprep.subr.mxu1 %v2500_v50 }
 0x3b8   : > { %1987 = vmatpush3.msra.mxu1 %v2500_v50 }
 0x3b9   : > { %1988 = vmatprep.subr.mxu1 %v2504_v51 }
 0x3ba   : > { %1989 = vmatpush3.msra.mxu1 %v2504_v51 }
 0x3bb   : > { %1990 = vmatprep.subr.mxu1 %v2508_v52 }
 0x3bc   : > { %1991 = vmatpush3.msra.mxu1 %v2508_v52 }
 0x3bd   : > { %1992 = vmatprep.subr.mxu1 %v2512_v53 }
 0x3be   : > { %1993 = vmatpush3.msra.mxu1 %v2512_v53 }
 0x3bf   : > { %1994 = vmatprep.subr.mxu1 %v2516_v54 }
 0x3c0   : > { %1995 = vmatpush3.msra.mxu1 %v2516_v54 }
 0x3c1   : > { %1996 = vmatprep.subr.mxu1 %v2520_v55 }
 0x3c2   : > { %1997 = vmatpush3.msra.mxu1 %v2520_v55 }
 0x3c3   : > { %1998 = vmatprep.subr.mxu1 %v2524_v56 }
 0x3c4   : > { %1999 = vmatpush3.msra.mxu1 %v2524_v56 }
 0x3c5   : > { %2000 = vmatprep.subr.mxu1 %v2528_v57 }
 0x3c6   : > { %2001 = vmatpush3.msra.mxu1 %v2528_v57  ;;  %v1611_v57 = vld [vmem:[%s2781_s5 + $0x48] sm:$0xff] }
 0x3c7   : > { %2003 = vmatmul.mubr.f32.vlgmr.msra.gmra.mxu1 %v2642_v36 }
 0x45f   : > { %v1956_v43 = vpop.f32.mrf.mxu1 }
 0x461   : > { %v1109_v44 = vpop.f32.mrf.mxu1 }
 0x463   : > { %v1959_v45 = vpop.f32.mrf.mxu1 }
 0x465   : > { %v1119_v46 = vpop.f32.mrf.mxu1 }
 0x467   : > { %v1966_v47 = vpop.f32.mrf.mxu1 }
 0x468   : > { %v1212_v48 = vadd.f32 %v1966_v47, %v1956_v43 }
 0x469   : > { %v1206_v49 = vpop.f32.mrf.mxu1 }
 0x46a   : > { %v1207_v50 = vadd.f32 %v1206_v49, %v1109_v44 }
 0x46b   : > { %v1969_v51 = vpop.f32.mrf.mxu1 }
 0x46c   : > { %v1222_v52 = vadd.f32 %v1969_v51, %v1959_v45 }
 0x46d   : > { %v1216_v53 = vpop.f32.mrf.mxu1 }
 0x46e   : > { %v1217_v54 = vadd.f32 %v1216_v53, %v1119_v46 }
 0x487   : > { %v2004_v55 = vpop.f32.mrf.mxu1 }
 0x488   : > { %2005 = vmatprep.subr.mxu0 %v2004_v55 }
 0x489   : > { %v1291_v56 = vpop.f32.mrf.mxu1  ;;  %2006 = vmatpush3.msra.mxu0 %v2004_v55 }
 0x48a   : > { %2007 = vmatprep.subr.mxu0 %v1291_v56 }
 0x48b   : > { %2008 = vmatpush3.msra.mxu0 %v1291_v56 }
 0x48c   : > { %2010 = vmatmul.mubr.msk.f32.vlgmr.msra.gmra.mxu0 %vm1030_vm2, %v1611_v57 }
 0x48d   : > { %2012 = vmatprep.mubr.msk.f32.mxu0 %vm1030_vm2, %v1612_v1 }
 0x490   : > { %2013 = vmatmul.mubr.msk.f32.gmra.mxu0 %vm1030_vm2, %v1613_v3 }
 0x54c   : > { %v2011_v13 = vpop.f32.mrf.mxu0 }
 0x54d   : > { %v1403_v15 = vadd.f32 %v2011_v13, %v1212_v48 }
 0x54e   : > { %v1383_v19 = vpop.f32.mrf.mxu0 }
 0x54f   : > { %v1431_v21 = vmul.f32 %v1418_v5, %v1403_v15  ;;  %v1402_v23 = vadd.f32 %v1383_v19, %v1207_v50 }
 0x550   : > { %v2014_v27 = vpop.f32.mrf.mxu0 }
 0x551   : > { %v1459_v29 = vadd.f32 %v1446_v17, %v1431_v21  ;;  %v1430_v31 = vmul.f32 %v1413_v7, %v1402_v23  ;;  %v1405_v2 = vadd.f32 %v2014_v27, %v1222_v52 }
 0x552   : > { %v1393_v4 = vpop.f32.mrf.mxu0 }
 0x553   : > { %v1619_v6 = vmul.f32 -1.442695, %v1459_v29  ;;  %v1458_v8 = vadd.f32 %v1441_v25, %v1430_v31  ;;  %v1433_v10 = vmul.f32 %v1428_v9, %v1405_v2  ;;  %v1404_v12 = vadd.f32 %v1393_v4, %v1217_v54 }
 0x555   : > { %2082 = vpow2.f32 %v1619_v6  ;;  %v1618_v16 = vmul.f32 -1.442695, %v1458_v8  ;;  %v1461_v18 = vadd.f32 %v1456_v14, %v1433_v10  ;;  %v1432_v20 = vmul.f32 %v1423_v11, %v1404_v12 }
 0x557   : > { %2084 = vpow2.f32 %v1618_v16  ;;  %v1621_v24 = vmul.f32 -1.442695, %v1461_v18  ;;  %v1460_v26 = vadd.f32 %v1451_v22, %v1432_v20 }
 0x559   : > { %2086 = vpow2.f32 %v1621_v24  ;;  %v1620_v28 = vmul.f32 -1.442695, %v1460_v26 }
 0x55b   : > { %2088 = vpow2.f32 %v1620_v28 }
 0x562   : > { %v2083_v30 = vpop.eup %2082 }
 0x563   : > { %v1475_v33 = vadd.f32 1.0, %v2083_v30 }
 0x564   : > { %v2085_v34 = vpop.eup %2084 }
 0x565   : > { %2090 = vrcp.f32 %v1475_v33  ;;  %v1474_v32 = vadd.f32 1.0, %v2085_v34 }
 0x566   : > { %v2087_v35 = vpop.eup %2086 }
 0x567   : > { %2092 = vrcp.f32 %v1474_v32  ;;  %v1477_v36 = vadd.f32 1.0, %v2087_v35 }
 0x568   : > { %v2089_v37 = vpop.eup %2088 }
 0x569   : > { %2094 = vrcp.f32 %v1477_v36  ;;  %v1476_v38 = vadd.f32 1.0, %v2089_v37 }
 0x56b   : > { %2096 = vrcp.f32 %v1476_v38 }
 0x572   : > { %v2091_v39 = vpop.eup %2090 }
 0x573   : > { %1487 = vst [vmem:[%s311_s10 + $0x8] sm:$0xff] %v2091_v39 }
 0x574   : > { %v2093_v40 = vpop.eup %2092 }
 0x575   : > { %1486 = vst [vmem:[%s311_s10] sm:$0xff] %v2093_v40 }
 0x576   : > { %v2095_v41 = vpop.eup %2094 }
 0x577   : > { %1489 = vst [vmem:[%s311_s10 + $0x18] sm:$0xff] %v2095_v41 }
 0x578   : > { %v2097_v58 = vpop.eup %2096 }
 0x579   : > { %1488 = vst [vmem:[%s311_s10 + $0x10] sm:$0xff] %v2097_v58 }
 0x57a   : > { %2137 = shalt.err (!%p2134_p0)
}
 0x57b   : > { %s2138_s24 = scalar_lea.hbm %s2732_s19, 512  ;;  %s2142_s10 = scalar_lea.hbm %s2784_s8, 1024 }
 0x57c   : > { %p2139_p1 = scmp.ne.s32.totalorder %s2732_s19, %s2138_s24  ;;  %p2143_p4 = scmp.lt.s32.totalorder %s2732_s19, %s2784_s8 }
 0x57d   : > { %p2144_p7 = scmp.lt.s32.totalorder %s2142_s10, %s2138_s24 }
 0x57e   : > { %p2140_p2 = pnand %p2139_p1, %p2282_p5 }
 0x57f   : > { %p2145_p6 = por %p2144_p7, %p2143_p4 }
 0x580   : > { %p2141_p3 = pneg %p2140_p2 }
 0x582   : > { %p2146_p8 = pnand %p2145_p6, %p2141_p3 }
 0x584   : > { %2149 = shalt.err (!%p2146_p8)
}
 0x585   : > { %s2197_s18 = smov 128   ;;  %s2198_s9 = smov 8  }
 0x586   : > { %2019 = dma.vmem_to_hbm [thread:$0]  (%p2282_p5), %s2734_s13, 512, %s2732_s19, %s2736_s20, %s2197_s18, %s2197_s18, %s2198_s9  }
 0x587 PF: > { %p2031_p9 = scmp.ge.s32.totalorder %s2188_s30, 2  ;;  %s1519_s21 = sand.u32 1, %s2176_s27  }
 0x588   : > { %p2788_p10 = scmp.ne.s32.totalorder %s2786_s16, 0  ;;  %s1520_s22 = scalar_lea.sflag [#allocation4], %s1519_s21 }
 0x58a   : > { %p2026_p11 = pnand %p2031_p9, %p2788_p10 }
 0x58c   : > { %p2027_p12 = pneg %p2026_p11 }
 0x58e   : > { %2171 = dma.done.wait (%p2027_p12), %s1520_s22, 512  }
 0x58f   : > { %2173 = vsyncadd (%p2027_p12), %s1520_s22, 4294966784  ;;  %p19_p13 = scmp.ge.s32.totalorder %s2269_s11, 4   ;;  %s2789_s27 = smov %s2180_s28 }
 0x590   : > { %s2790_s28 = smov %s2184_s29  ;;  %s2791_s29 = smov %s2280_s14 }
 0x591   : > { %s2792_s30 = smov %s2269_s11  ;;  %21 = sbr.rel (!%p19_p13) target bundleno = 4 (0x4), region = 98 }
 0x596   :  { %1525 = vsyncpa [#allocation3], 1 }
 0x597   :  { %1527 = vsyncpa [#allocation3 + $0x1], 1 }
 0x598   :  { %1528 = vsyncpa [#allocation4], 1 }
 0x599   :  { %1530 = vsyncpa [#allocation4 + $0x1], 1 }

</bundles_post_ra>
